<compile_context>
chip_gen: v7x
topology: tpu7x:2x2x1
jax: 0.10.0
libtpu: 0.0.40
codegen_flags: <defaults>
</compile_context>

<pallas_src>
import jax
import jax.numpy as jnp
from jax import lax
from jax.experimental import pallas as pl
from jax.experimental.pallas import tpu as pltpu

LANE = 128
SUBLANE = 8
OUT_W = 8          # lane width of the output slab (>= 2 real classes)
N_CLASSES = 2


def _round_up(x, m):
    return ((x + m - 1) // m) * m


def _cdiv(a, b):
    return (a + b - 1) // b


def mlp_kernel(x_ref, w1_ref, b1_ref, w2_ref, b2_ref, w3_ref, b3_ref, o_ref):
    """One batch tile of the 3-layer MLP with the 2-class softmax folded in."""
    # x arrives in its native dtype; cast to bf16 in-kernel for the MXU.
    x = x_ref[...].astype(jnp.bfloat16)

    # Layer 1: Linear + ReLU (dropout == identity in eval mode).
    h1 = jnp.dot(x, w1_ref[...], preferred_element_type=jnp.float32)
    h1 = jnp.maximum(h1 + b1_ref[...], 0.0)                       # (TB, Hp) f32

    # Layer 2: Linear + ReLU.
    h2 = jnp.dot(h1.astype(jnp.bfloat16), w2_ref[...],
                 preferred_element_type=jnp.float32)
    h2 = jnp.maximum(h2 + b2_ref[...], 0.0)                       # (TB, H2p) f32

    # Layer 3 with the softmax folded into the weights:
    #   col 0 of w3_ref/b3_ref holds (w3[:,0]-w3[:,1], b3[0]-b3[1]),
    #   col 1 holds the negation, cols 2.. are zero.
    d = jnp.dot(h2.astype(jnp.bfloat16), w3_ref[...],
                preferred_element_type=jnp.float32) + b3_ref[...]  # (TB, OUT_W)

    # 2-class softmax == sigmoid of the logit difference (exact).
    # exp(-d) can overflow to inf for extreme logit gaps; that saturates the
    # probability to 0/1, which is the correct limiting value.
    p = 1.0 / (1.0 + jnp.exp(-d))                                  # col0=p0, col1=p1

    col = lax.broadcasted_iota(jnp.int32, o_ref.shape, 1)
    o_ref[...] = jnp.where(col < N_CLASSES, p, 0.0)


def prepare_params(params):
    """One-time prep: pad / cast / softmax-fold the Linear parameters.

    `params` holds (in, out)-layout weights and (1, out) biases.  (PyTorch's
    Linear stores W as (out, in); transpose before calling this.)  Padding of
    hidden columns with zeros is exact: padded units are ReLU(0)=0 and multiply
    zero weight rows downstream.
    """
    w1 = jnp.asarray(params["w1"], jnp.float32)
    b1 = jnp.asarray(params["b1"], jnp.float32).reshape(1, -1)
    w2 = jnp.asarray(params["w2"], jnp.float32)
    b2 = jnp.asarray(params["b2"], jnp.float32).reshape(1, -1)
    w3 = jnp.asarray(params["w3"], jnp.float32)
    b3 = jnp.asarray(params["b3"], jnp.float32).reshape(-1)

    F, H = w1.shape
    H2 = w2.shape[1]
    Hp = _round_up(H, LANE)        # lane-dense hidden layer (128 MXU lanes)
    H2p = _round_up(H2, SUBLANE)   # n_hid//4 only needs sublane alignment

    def pad2(a, r, c):
        return jnp.pad(a, ((0, r - a.shape[0]), (0, c - a.shape[1])))

    w1p = pad2(w1, F, Hp).astype(jnp.bfloat16)                     # (F, Hp)
    b1p = pad2(b1, 1, Hp)                                          # (1, Hp) f32
    w2p = pad2(w2, Hp, H2p).astype(jnp.bfloat16)                   # (Hp, H2p)
    b2p = pad2(b2, 1, H2p)                                         # (1, H2p) f32

    # Fold the 2-class softmax: the last matmul produces +/-(l0 - l1).
    w3_diff = (w3[:, 0] - w3[:, 1])[:, None]                       # (H2, 1)
    b3_diff = b3[0] - b3[1]
    w3p = jnp.concatenate(
        [w3_diff, -w3_diff, jnp.zeros((H2, OUT_W - 2), jnp.float32)], axis=1)
    w3p = pad2(w3p, H2p, OUT_W).astype(jnp.bfloat16)               # (H2p, OUT_W)
    b3p = jnp.zeros((1, OUT_W), jnp.float32)
    b3p = b3p.at[0, 0].set(b3_diff).at[0, 1].set(-b3_diff)

    return dict(w1=w1p, b1=b1p, w2=w2p, b2=b2p, w3=w3p, b3=b3p)


def pytorch_mlp_forward(x, prepared, *, block_b=512):
    """Eval-mode forward pass. x: (B, num_features) -> (B, 2) f32 probabilities."""
    B, F = x.shape
    w1p, b1p = prepared["w1"], prepared["b1"]
    w2p, b2p = prepared["w2"], prepared["b2"]
    w3p, b3p = prepared["w3"], prepared["b3"]
    assert w1p.shape[0] == F, "num_features mismatch with prepared params"
    Hp, H2p = w1p.shape[1], w2p.shape[1]
    x_bytes = jnp.dtype(x.dtype).itemsize

    # Batch tile: multiple of 8 sublanes, and >= 2 grid steps when the batch
    # allows it so the "parallel" grid axis shards across v7x's 2 TensorCores.
    if B <= SUBLANE:
        TB = SUBLANE
    else:
        TB = min(block_b, _round_up(_cdiv(B, 2), SUBLANE))
    # Keep the double-buffered x tile within a conservative VMEM budget
    # (v7x: 64 MiB / TC) — shrinks TB automatically for very wide feature dims.
    max_tb = max(SUBLANE, ((24 << 20) // (2 * F * x_bytes)) // SUBLANE * SUBLANE)
    TB = min(TB, max_tb)
    Bp = _round_up(B, TB)
    if Bp != B:
        # Row-only pad (no feature pad, no dtype change); padded rows are
        # sliced off below, so their (nonzero-bias) outputs never matter.
        x = jnp.pad(x, ((0, Bp - B), (0, 0)))

    # Explicit VMEM budget: double-buffered x/out tiles, single-buffered
    # weights, f32 + bf16 intermediates, plus slack.
    vmem_bytes = (
        2 * TB * F * x_bytes                        # x pipeline buffers
        + 2 * TB * OUT_W * 4                        # out pipeline buffers
        + (F * Hp + Hp * H2p + H2p * OUT_W) * 2     # bf16 weights (x1 buffer)
        + (Hp + H2p + OUT_W) * 4 * SUBLANE          # biases (sublane padded)
        + 2 * TB * (Hp + H2p) * 6                   # h1/h2 f32 + bf16 copies
    )
    vmem_bytes = min(max(int(vmem_bytes * 1.5) + (4 << 20), 8 << 20), 64 << 20)

    flops = 2 * Bp * (F * Hp + Hp * H2p + H2p * OUT_W)
    bytes_accessed = (Bp * F * x_bytes
                      + (F * Hp + Hp * H2p + H2p * OUT_W) * 2
                      + (Hp + H2p + OUT_W) * 4
                      + Bp * OUT_W * 4)

    def run(single_buffer_weights):
        if single_buffer_weights:
            # Constant-index blocks never re-DMA; one pipeline buffer suffices.
            resident = lambda s: pl.BlockSpec(s, lambda i: (0, 0),
                                              pipeline_mode=pl.Buffered(1))
        else:
            resident = lambda s: pl.BlockSpec(s, lambda i: (0, 0))
        return pl.pallas_call(
            mlp_kernel,
            out_shape=jax.ShapeDtypeStruct((Bp, OUT_W), jnp.float32),
            grid=(Bp // TB,),
            in_specs=[
                pl.BlockSpec((TB, F), lambda i: (i, 0)),   # batch-tiled input
                resident(w1p.shape), resident(b1p.shape),  # VMEM-resident params
                resident(w2p.shape), resident(b2p.shape),
                resident(w3p.shape), resident(b3p.shape),
            ],
            out_specs=pl.BlockSpec((TB, OUT_W), lambda i: (i, 0)),
            compiler_params=pltpu.CompilerParams(
                dimension_semantics=("parallel",),
                vmem_limit_bytes=vmem_bytes),
            cost_estimate=pl.CostEstimate(
                flops=int(flops),
                transcendentals=int(Bp * OUT_W),
                bytes_accessed=int(bytes_accessed)),
        )(x, w1p, b1p, w2p, b2p, w3p, b3p)

    try:
        out_pad = run(True)
    except Exception:
        # Fallback: default double-buffered weight blocks (functionally identical).
        out_pad = run(False)

    return out_pad[:B, :N_CLASSES]


def init_params(key, num_features, n_hid=128):
    """Deterministic init matching PyTorch: kaiming_normal_ weights, zero bias.

    kaiming_normal_ (fan_in mode, leaky_relu a=0) => std = sqrt(2 / fan_in).
    Weights stored (in, out) for the kernel.
    """
    h2 = n_hid // 4
    k1, k2, k3 = jax.random.split(key, 3)

    def kaiming(k, fan_in, fan_out):
        std = (2.0 / fan_in) ** 0.5
        return jax.random.normal(k, (fan_in, fan_out), dtype=jnp.float32) * std

    return {
        "w1": kaiming(k1, num_features, n_hid),
        "b1": jnp.zeros((1, n_hid), jnp.float32),
        "w2": kaiming(k2, n_hid, h2),
        "b2": jnp.zeros((1, h2), jnp.float32),
        "w3": kaiming(k3, h2, 2),
        "b3": jnp.zeros((1, 2), jnp.float32),
    }


if __name__ == "__main__":
    # Small shapes consistent with the module: batch=8, num_features=32, n_hid=32.
    B, F, H = 8, 32, 32
    key = jax.random.PRNGKey(0)
    kx, kp = jax.random.split(key)

    x = jax.random.normal(kx, (B, F), dtype=jnp.float32)
    params = init_params(kp, num_features=F, n_hid=H)
    prepared = prepare_params(params)        # one-time pad / cast / softmax-fold

    out = pytorch_mlp_forward(x, prepared)
    out = jax.block_until_ready(out)

    # Sanity: shape (B, 2) and rows sum to 1.
    assert out.shape == (B, N_CLASSES)
    assert jnp.allclose(jnp.sum(out, axis=-1), 1.0, atol=1e-5)

    # Cross-check against a pure-f32 JAX reference of the same math.
    # (Kernel matmuls run in bf16 on the MXU, so allow bf16-level tolerance.)
    def ref(xx, p):
        h1 = jnp.maximum(xx @ p["w1"] + p["b1"], 0.0)
        h2 = jnp.maximum(h1 @ p["w2"] + p["b2"], 0.0)
        lg = h2 @ p["w3"] + p["b3"]
        return jax.nn.softmax(lg, axis=-1)

    assert jnp.allclose(out, ref(x, params), atol=2e-2)

    print("KERNEL_OK")
</pallas_src>

<mosaic_0001>
module attributes {stable_mosaic.version = 11 : i64} {
  func.func @mlp_kernel(%arg0: i32, %arg1: memref<8x32xf32, #tpu.memory_space<vmem>>, %arg2: memref<32x128xbf16, #tpu.memory_space<vmem>>, %arg3: memref<1x128xf32, #tpu.memory_space<vmem>>, %arg4: memref<128x8xbf16, #tpu.memory_space<vmem>>, %arg5: memref<1x8xf32, #tpu.memory_space<vmem>>, %arg6: memref<8x8xbf16, #tpu.memory_space<vmem>>, %arg7: memref<1x8xf32, #tpu.memory_space<vmem>>, %arg8: memref<8x8xf32, #tpu.memory_space<vmem>>) attributes {dimension_semantics = [#tpu.dimension_semantics<parallel>], iteration_bounds = array<i64: 1>, scalar_prefetch = 0 : i64, scratch_operands = 0 : i64, tpu.core_type = #tpu.core_type<tc>, window_params = [{transform_indices = @transform_0, window_bounds = array<i64: 8, 32>}, {pipeline_mode = #tpu.pipeline_mode<synchronous>, transform_indices = @transform_1, window_bounds = array<i64: 32, 128>}, {pipeline_mode = #tpu.pipeline_mode<synchronous>, transform_indices = @transform_2, window_bounds = array<i64: 1, 128>}, {pipeline_mode = #tpu.pipeline_mode<synchronous>, transform_indices = @transform_3, window_bounds = array<i64: 128, 8>}, {pipeline_mode = #tpu.pipeline_mode<synchronous>, transform_indices = @transform_4, window_bounds = array<i64: 1, 8>}, {pipeline_mode = #tpu.pipeline_mode<synchronous>, transform_indices = @transform_5, window_bounds = array<i64: 8, 8>}, {pipeline_mode = #tpu.pipeline_mode<synchronous>, transform_indices = @transform_6, window_bounds = array<i64: 1, 8>}, {transform_indices = @transform_7, window_bounds = array<i64: 8, 8>}]} {
    %c0 = arith.constant 0 : index
    %c0_0 = arith.constant 0 : index
    %0 = vector.load %arg1[%c0, %c0_0] : memref<8x32xf32, #tpu.memory_space<vmem>>, vector<8x32xf32>
    %1 = arith.truncf %0 : vector<8x32xf32> to vector<8x32xbf16>
    %c0_1 = arith.constant 0 : index
    %c0_2 = arith.constant 0 : index
    %2 = vector.load %arg2[%c0_1, %c0_2] : memref<32x128xbf16, #tpu.memory_space<vmem>>, vector<32x128xbf16>
    %cst = arith.constant dense<0.000000e+00> : vector<8x128xf32>
    %3 = tpu.matmul %1, %2, %cst {dimension_numbers = #tpu.dot_dimension_numbers<[1], [0], [0], [1], [0, 0, 1, 1], [], []>} : vector<8x32xbf16>, vector<32x128xbf16>, vector<8x128xf32> -> vector<8x128xf32>
    %c0_3 = arith.constant 0 : index
    %c0_4 = arith.constant 0 : index
    %4 = vector.load %arg3[%c0_3, %c0_4] : memref<1x128xf32, #tpu.memory_space<vmem>>, vector<1x128xf32>
    %5 = vector.broadcast %4 : vector<1x128xf32> to vector<8x128xf32>
    %6 = arith.addf %3, %5 : vector<8x128xf32>
    %cst_5 = arith.constant 0.000000e+00 : f32
    %7 = vector.broadcast %cst_5 : f32 to vector<8x128xf32>
    %8 = arith.maximumf %6, %7 : vector<8x128xf32>
    %9 = arith.truncf %8 : vector<8x128xf32> to vector<8x128xbf16>
    %c0_6 = arith.constant 0 : index
    %c0_7 = arith.constant 0 : index
    %10 = vector.load %arg4[%c0_6, %c0_7] : memref<128x8xbf16, #tpu.memory_space<vmem>>, vector<128x8xbf16>
    %cst_8 = arith.constant dense<0.000000e+00> : vector<8x8xf32>
    %11 = tpu.matmul %9, %10, %cst_8 {dimension_numbers = #tpu.dot_dimension_numbers<[1], [0], [0], [1], [0, 0, 1, 1], [], []>} : vector<8x128xbf16>, vector<128x8xbf16>, vector<8x8xf32> -> vector<8x8xf32>
    %c0_9 = arith.constant 0 : index
    %c0_10 = arith.constant 0 : index
    %12 = vector.load %arg5[%c0_9, %c0_10] : memref<1x8xf32, #tpu.memory_space<vmem>>, vector<1x8xf32>
    %13 = vector.broadcast %12 : vector<1x8xf32> to vector<8x8xf32>
    %14 = arith.addf %11, %13 : vector<8x8xf32>
    %cst_11 = arith.constant 0.000000e+00 : f32
    %15 = vector.broadcast %cst_11 : f32 to vector<8x8xf32>
    %16 = arith.maximumf %14, %15 : vector<8x8xf32>
    %17 = arith.truncf %16 : vector<8x8xf32> to vector<8x8xbf16>
    %c0_12 = arith.constant 0 : index
    %c0_13 = arith.constant 0 : index
    %18 = vector.load %arg6[%c0_12, %c0_13] : memref<8x8xbf16, #tpu.memory_space<vmem>>, vector<8x8xbf16>
    %cst_14 = arith.constant dense<0.000000e+00> : vector<8x8xf32>
    %19 = tpu.matmul %17, %18, %cst_14 {dimension_numbers = #tpu.dot_dimension_numbers<[1], [0], [0], [1], [0, 0, 1, 1], [], []>} : vector<8x8xbf16>, vector<8x8xbf16>, vector<8x8xf32> -> vector<8x8xf32>
    %c0_15 = arith.constant 0 : index
    %c0_16 = arith.constant 0 : index
    %20 = vector.load %arg7[%c0_15, %c0_16] : memref<1x8xf32, #tpu.memory_space<vmem>>, vector<1x8xf32>
    %21 = vector.broadcast %20 : vector<1x8xf32> to vector<8x8xf32>
    %22 = arith.addf %19, %21 : vector<8x8xf32>
    %cst_17 = arith.constant 0.000000e+00 : f32
    %23 = vector.broadcast %cst_17 : f32 to vector<8x8xf32>
    %24 = arith.subf %23, %22 : vector<8x8xf32>
    %25 = math.exp %24 : vector<8x8xf32>
    %cst_18 = arith.constant 1.000000e+00 : f32
    %26 = vector.broadcast %cst_18 : f32 to vector<8x8xf32>
    %27 = arith.addf %26, %25 : vector<8x8xf32>
    %cst_19 = arith.constant 1.000000e+00 : f32
    %28 = vector.broadcast %cst_19 : f32 to vector<8x8xf32>
    %29 = arith.divf %28, %27 : vector<8x8xf32>
    %30 = tpu.iota {dimensions = array<i32: 1>} : vector<8x8xi32>
    %c2_i32 = arith.constant 2 : i32
    %31 = vector.broadcast %c2_i32 : i32 to vector<8x8xi32>
    %32 = arith.cmpi slt, %30, %31 : vector<8x8xi32>
    %cst_20 = arith.constant 0.000000e+00 : f32
    %33 = vector.broadcast %cst_20 : f32 to vector<8x8xf32>
    %34 = arith.select %32, %29, %33 : vector<8x8xi1>, vector<8x8xf32>
    %c0_21 = arith.constant 0 : index
    %c0_22 = arith.constant 0 : index
    %35 = vector.load %arg8[%c0_21, %c0_22] : memref<8x8xf32, #tpu.memory_space<vmem>>, vector<8x8xf32>
    tpu.vector_store %arg8[%c0_21, %c0_22], %34 {strides = array<i32>} : memref<8x8xf32, #tpu.memory_space<vmem>>, vector<8x8xf32>,
    return
  }
  func.func @transform_0(%arg0: i32) -> (i32, i32) {
    %c0_i32 = arith.constant 0 : i32
    %c0_i32_0 = arith.constant 0 : i32
    return %arg0, %c0_i32 : i32, i32
  }
  func.func @transform_1(%arg0: i32) -> (i32, i32) {
    %c0_i32 = arith.constant 0 : i32
    %c0_i32_0 = arith.constant 0 : i32
    %c0_i32_1 = arith.constant 0 : i32
    return %c0_i32, %c0_i32_0 : i32, i32
  }
  func.func @transform_2(%arg0: i32) -> (i32, i32) {
    %c0_i32 = arith.constant 0 : i32
    %c0_i32_0 = arith.constant 0 : i32
    %c0_i32_1 = arith.constant 0 : i32
    return %c0_i32, %c0_i32_0 : i32, i32
  }
  func.func @transform_3(%arg0: i32) -> (i32, i32) {
    %c0_i32 = arith.constant 0 : i32
    %c0_i32_0 = arith.constant 0 : i32
    %c0_i32_1 = arith.constant 0 : i32
    return %c0_i32, %c0_i32_0 : i32, i32
  }
  func.func @transform_4(%arg0: i32) -> (i32, i32) {
    %c0_i32 = arith.constant 0 : i32
    %c0_i32_0 = arith.constant 0 : i32
    %c0_i32_1 = arith.constant 0 : i32
    return %c0_i32, %c0_i32_0 : i32, i32
  }
  func.func @transform_5(%arg0: i32) -> (i32, i32) {
    %c0_i32 = arith.constant 0 : i32
    %c0_i32_0 = arith.constant 0 : i32
    %c0_i32_1 = arith.constant 0 : i32
    return %c0_i32, %c0_i32_0 : i32, i32
  }
  func.func @transform_6(%arg0: i32) -> (i32, i32) {
    %c0_i32 = arith.constant 0 : i32
    %c0_i32_0 = arith.constant 0 : i32
    %c0_i32_1 = arith.constant 0 : i32
    return %c0_i32, %c0_i32_0 : i32, i32
  }
  func.func @transform_7(%arg0: i32) -> (i32, i32) {
    %c0_i32 = arith.constant 0 : i32
    %c0_i32_0 = arith.constant 0 : i32
    return %arg0, %c0_i32 : i32, i32
  }
}

module attributes {stable_mosaic.version = 11 : i64} {
  func.func @mlp_kernel(%arg0: i32, %arg1: memref<8x32xf32, #tpu.memory_space<vmem>>, %arg2: memref<32x128xbf16, #tpu.memory_space<vmem>>, %arg3: memref<1x128xf32, #tpu.memory_space<vmem>>, %arg4: memref<128x8xbf16, #tpu.memory_space<vmem>>, %arg5: memref<1x8xf32, #tpu.memory_space<vmem>>, %arg6: memref<8x8xbf16, #tpu.memory_space<vmem>>, %arg7: memref<1x8xf32, #tpu.memory_space<vmem>>, %arg8: memref<8x8xf32, #tpu.memory_space<vmem>>) attributes {dimension_semantics = [#tpu.dimension_semantics<parallel>], iteration_bounds = array<i64: 1>, scalar_prefetch = 0 : i64, scratch_operands = 0 : i64, tpu.core_type = #tpu.core_type<tc>, window_params = [{transform_indices = @transform_0, window_bounds = array<i64: 8, 32>}, {pipeline_mode = #tpu.pipeline_mode<synchronous>, transform_indices = @transform_1, window_bounds = array<i64: 32, 128>}, {pipeline_mode = #tpu.pipeline_mode<synchronous>, transform_indices = @transform_2, window_bounds = array<i64: 1, 128>}, {pipeline_mode = #tpu.pipeline_mode<synchronous>, transform_indices = @transform_3, window_bounds = array<i64: 128, 8>}, {pipeline_mode = #tpu.pipeline_mode<synchronous>, transform_indices = @transform_4, window_bounds = array<i64: 1, 8>}, {pipeline_mode = #tpu.pipeline_mode<synchronous>, transform_indices = @transform_5, window_bounds = array<i64: 8, 8>}, {pipeline_mode = #tpu.pipeline_mode<synchronous>, transform_indices = @transform_6, window_bounds = array<i64: 1, 8>}, {transform_indices = @transform_7, window_bounds = array<i64: 8, 8>}]} {
    %c0 = arith.constant 0 : index
    %c0_0 = arith.constant 0 : index
    %0 = vector.load %arg1[%c0, %c0_0] : memref<8x32xf32, #tpu.memory_space<vmem>>, vector<8x32xf32>
    %1 = arith.truncf %0 : vector<8x32xf32> to vector<8x32xbf16>
    %c0_1 = arith.constant 0 : index
    %c0_2 = arith.constant 0 : index
    %2 = vector.load %arg2[%c0_1, %c0_2] : memref<32x128xbf16, #tpu.memory_space<vmem>>, vector<32x128xbf16>
    %cst = arith.constant dense<0.000000e+00> : vector<8x128xf32>
    %3 = tpu.matmul %1, %2, %cst {dimension_numbers = #tpu.dot_dimension_numbers<[1], [0], [0], [1], [0, 0, 1, 1], [], []>} : vector<8x32xbf16>, vector<32x128xbf16>, vector<8x128xf32> -> vector<8x128xf32>
    %c0_3 = arith.constant 0 : index
    %c0_4 = arith.constant 0 : index
    %4 = vector.load %arg3[%c0_3, %c0_4] : memref<1x128xf32, #tpu.memory_space<vmem>>, vector<1x128xf32>
    %5 = vector.broadcast %4 : vector<1x128xf32> to vector<8x128xf32>
    %6 = arith.addf %3, %5 : vector<8x128xf32>
    %cst_5 = arith.constant 0.000000e+00 : f32
    %7 = vector.broadcast %cst_5 : f32 to vector<8x128xf32>
    %8 = arith.maximumf %6, %7 : vector<8x128xf32>
    %9 = arith.truncf %8 : vector<8x128xf32> to vector<8x128xbf16>
    %c0_6 = arith.constant 0 : index
    %c0_7 = arith.constant 0 : index
    %10 = vector.load %arg4[%c0_6, %c0_7] : memref<128x8xbf16, #tpu.memory_space<vmem>>, vector<128x8xbf16>
    %cst_8 = arith.constant dense<0.000000e+00> : vector<8x8xf32>
    %11 = tpu.matmul %9, %10, %cst_8 {dimension_numbers = #tpu.dot_dimension_numbers<[1], [0], [0], [1], [0, 0, 1, 1], [], []>} : vector<8x128xbf16>, vector<128x8xbf16>, vector<8x8xf32> -> vector<8x8xf32>
    %c0_9 = arith.constant 0 : index
    %c0_10 = arith.constant 0 : index
    %12 = vector.load %arg5[%c0_9, %c0_10] : memref<1x8xf32, #tpu.memory_space<vmem>>, vector<1x8xf32>
    %13 = vector.broadcast %12 : vector<1x8xf32> to vector<8x8xf32>
    %14 = arith.addf %11, %13 : vector<8x8xf32>
    %cst_11 = arith.constant 0.000000e+00 : f32
    %15 = vector.broadcast %cst_11 : f32 to vector<8x8xf32>
    %16 = arith.maximumf %14, %15 : vector<8x8xf32>
    %17 = arith.truncf %16 : vector<8x8xf32> to vector<8x8xbf16>
    %c0_12 = arith.constant 0 : index
    %c0_13 = arith.constant 0 : index
    %18 = vector.load %arg6[%c0_12, %c0_13] : memref<8x8xbf16, #tpu.memory_space<vmem>>, vector<8x8xbf16>
    %cst_14 = arith.constant dense<0.000000e+00> : vector<8x8xf32>
    %19 = tpu.matmul %17, %18, %cst_14 {dimension_numbers = #tpu.dot_dimension_numbers<[1], [0], [0], [1], [0, 0, 1, 1], [], []>} : vector<8x8xbf16>, vector<8x8xbf16>, vector<8x8xf32> -> vector<8x8xf32>
    %c0_15 = arith.constant 0 : index
    %c0_16 = arith.constant 0 : index
    %20 = vector.load %arg7[%c0_15, %c0_16] : memref<1x8xf32, #tpu.memory_space<vmem>>, vector<1x8xf32>
    %21 = vector.broadcast %20 : vector<1x8xf32> to vector<8x8xf32>
    %22 = arith.addf %19, %21 : vector<8x8xf32>
    %cst_17 = arith.constant 0.000000e+00 : f32
    %23 = vector.broadcast %cst_17 : f32 to vector<8x8xf32>
    %24 = arith.subf %23, %22 : vector<8x8xf32>
    %25 = math.exp %24 : vector<8x8xf32>
    %cst_18 = arith.constant 1.000000e+00 : f32
    %26 = vector.broadcast %cst_18 : f32 to vector<8x8xf32>
    %27 = arith.addf %26, %25 : vector<8x8xf32>
    %cst_19 = arith.constant 1.000000e+00 : f32
    %28 = vector.broadcast %cst_19 : f32 to vector<8x8xf32>
    %29 = arith.divf %28, %27 : vector<8x8xf32>
    %30 = tpu.iota {dimensions = array<i32: 1>} : vector<8x8xi32>
    %c2_i32 = arith.constant 2 : i32
    %31 = vector.broadcast %c2_i32 : i32 to vector<8x8xi32>
    %32 = arith.cmpi slt, %30, %31 : vector<8x8xi32>
    %cst_20 = arith.constant 0.000000e+00 : f32
    %33 = vector.broadcast %cst_20 : f32 to vector<8x8xf32>
    %34 = arith.select %32, %29, %33 : vector<8x8xi1>, vector<8x8xf32>
    %c0_21 = arith.constant 0 : index
    %c0_22 = arith.constant 0 : index
    %35 = vector.load %arg8[%c0_21, %c0_22] : memref<8x8xf32, #tpu.memory_space<vmem>>, vector<8x8xf32>
    tpu.vector_store %arg8[%c0_21, %c0_22], %34 {strides = array<i32>} : memref<8x8xf32, #tpu.memory_space<vmem>>, vector<8x8xf32>,
    return
  }
  func.func @transform_0(%arg0: i32) -> (i32, i32) {
    %c0_i32 = arith.constant 0 : i32
    %c0_i32_0 = arith.constant 0 : i32
    return %arg0, %c0_i32 : i32, i32
  }
  func.func @transform_1(%arg0: i32) -> (i32, i32) {
    %c0_i32 = arith.constant 0 : i32
    %c0_i32_0 = arith.constant 0 : i32
    %c0_i32_1 = arith.constant 0 : i32
    return %c0_i32, %c0_i32_0 : i32, i32
  }
  func.func @transform_2(%arg0: i32) -> (i32, i32) {
    %c0_i32 = arith.constant 0 : i32
    %c0_i32_0 = arith.constant 0 : i32
    %c0_i32_1 = arith.constant 0 : i32
    return %c0_i32, %c0_i32_0 : i32, i32
  }
  func.func @transform_3(%arg0: i32) -> (i32, i32) {
    %c0_i32 = arith.constant 0 : i32
    %c0_i32_0 = arith.constant 0 : i32
    %c0_i32_1 = arith.constant 0 : i32
    return %c0_i32, %c0_i32_0 : i32, i32
  }
  func.func @transform_4(%arg0: i32) -> (i32, i32) {
    %c0_i32 = arith.constant 0 : i32
    %c0_i32_0 = arith.constant 0 : i32
    %c0_i32_1 = arith.constant 0 : i32
    return %c0_i32, %c0_i32_0 : i32, i32
  }
  func.func @transform_5(%arg0: i32) -> (i32, i32) {
    %c0_i32 = arith.constant 0 : i32
    %c0_i32_0 = arith.constant 0 : i32
    %c0_i32_1 = arith.constant 0 : i32
    return %c0_i32, %c0_i32_0 : i32, i32
  }
  func.func @transform_6(%arg0: i32) -> (i32, i32) {
    %c0_i32 = arith.constant 0 : i32
    %c0_i32_0 = arith.constant 0 : i32
    %c0_i32_1 = arith.constant 0 : i32
    return %c0_i32, %c0_i32_0 : i32, i32
  }
  func.func @transform_7(%arg0: i32) -> (i32, i32) {
    %c0_i32 = arith.constant 0 : i32
    %c0_i32_0 = arith.constant 0 : i32
    return %arg0, %c0_i32 : i32, i32
  }
}

</mosaic_0001>

<bundles_post_ra>
// kernel: tpu_custom_call.1
= control target key start
LH: loop header
LB: loop body
LE: loop exit
PB: predicated region body
PF: predicated region fallthrough
CT: control target
= control target key end

     0   :  { %v397_v1 = vmov 0.0   ;;  %vm398_vm0 = vmmov 0   ;;  %vm53_vm1 = vcmask 261120   ;;  %s502_s0 = inlined_call_operand.vmem [shape: f32[8,32], index: 0, kind: input, shape index: {}]   ;;  %s503_s1 = inlined_call_operand.vmem [shape: bf16[32,128], index: 1, kind: input, shape index: {}]   ;;  %s504_s2 = inlined_call_operand.vmem [shape: f32[1,128], index: 2, kind: input, shape index: {}]   ;;  %s505_s3 = inlined_call_operand.vmem [shape: bf16[128,8], index: 3, kind: input, shape index: {}]   ;;  %s506_s4 = inlined_call_operand.vmem [shape: f32[1,8], index: 4, kind: input, shape index: {}]   ;;  %s507_s5 = inlined_call_operand.vmem [shape: bf16[8,8], index: 5, kind: input, shape index: {}]   ;;  %s508_s6 = inlined_call_operand.vmem [shape: f32[1,8], index: 6, kind: input, shape index: {}]   ;;  %s509_s7 = inlined_call_operand.hbm [shape: f32[8,8], index: 7, kind: output, shape index: {}]  }
   0x1   :  { %v359_v0 = vld [vmem:[%s503_s1] sm:$0xff]   ;;  %322 = vmatprep.subr.bf16.mxu0 %v397_v1  ;;  %v360_v2 = vld [vmem:[%s503_s1 + $0x8] sm:$0xff]   ;;  %330 = vmatprep.subr.bf16.mxu1 %v397_v1  ;;  %v363_v7 = vld [vmem:[%s505_s3 + $0x10] sm:$0xff]  }
   0x2   :  { %323 = vmatpush3.bf16.msra.mxu0 %v359_v0  ;;  %326 = vmatprep.mubr.msk.bf16.mxu0 %vm398_vm0, %v397_v1  ;;  %v28_v3 = vld [vmem:[%s502_s0] sm:$0xff]  ;;  %v362_v6 = vld [vmem:[%s505_s3 + $0x8] sm:$0xff]  }
   0x3   :  { %324 = vmatprep.subr.bf16.mxu0 %v397_v1  ;;  %v361_v4 = vld [vmem:[%s505_s3] sm:$0xff]   ;;  %346 = vmatprep.mubr.msk.bf16.mxu1 %vm398_vm0, %v397_v1  ;;  %v29_v5 = vpack.c.bf16 %v28_v3, %v28_v3 }
   0x4   :  { %331 = vmatpush3.bf16.msra.mxu1 %v361_v4 }
   0x5   :  { %332 = vmatprep.subr.bf16.mxu1 %v397_v1 }
   0x6   :  { %325 = vmatpush3.bf16.msra.mxu0 %v360_v2 }
   0x7   :  { %350 = vmatprep.subr.bf16.mxu0 %v397_v1 }
   0x8   :  { %333 = vmatpush3.bf16.msra.mxu1 %v362_v6 }
   0x9   :  { %327 = vmatmul.mubr.msk.bf16.vlgmr.msra.gmra.mrb[0].mxu0 %vm53_vm1, %v29_v5  ;;  %334 = vmatprep.subr.bf16.mxu1 %v397_v1 }
   0xa   :  { %352 = vmatprep.mubr.msk.bf16.mxu0 %vm398_vm0, %v397_v1 }
   0xb   :  { %12 = vsyncpa [#allocation3], 0  ;;  %v364_v8 = vld [vmem:[%s505_s3 + $0x18] sm:$0xff]   ;;  %v365_v9 = vld [vmem:[%s505_s3 + $0x20] sm:$0xff]   ;;  %vm224_vm2 = vcmask 1043456   ;;  %vm220_vm3 = vcmask 64512   ;;  %v274_v41 = vlaneseq }
   0xc   :  { %335 = vmatpush3.bf16.msra.mxu1 %v363_v7  ;;  %v366_v10 = vld [vmem:[%s505_s3 + $0x28] sm:$0xff]   ;;  %v367_v11 = vld [vmem:[%s505_s3 + $0x30] sm:$0xff]   ;;  %v368_v12 = vld [vmem:[%s505_s3 + $0x38] sm:$0xff]  }
   0xd   :  { %336 = vmatprep.subr.bf16.mxu1 %v397_v1  ;;  %v212_v13 = vld [vmem:[%s507_s5] sm:$0xf]  ;;  %v275_v42 = vand.u32 127, %v274_v41 }
   0xe   :  { %v226_v14 = vsel %vm224_vm2, %v212_v13, 0  ;;  %v293_v15 = vld [vmem:[%s504_s2] ss:$0 sm:$0xff] }
   0xf   :  { %351 = vmatpush3.bf16.msra.mxu0 %v226_v14  ;;  %v297_v23 = vld [vmem:[%s506_s4] ss:$0 sm:$0xff]  ;;  %s399_s4 = smov [#allocation2]   ;;  %vm276_vm4 = vcmp.lt.s32.totalorder %v275_v42, 2 }
  0x10   :  { %337 = vmatpush3.bf16.msra.mxu1 %v364_v8  ;;  %v306_v31 = vld [vmem:[%s508_s6] ss:$0 sm:$0xff]  ;;  %s285_s26 = sshll.u32 %s399_s4, 4  ;;  %s286_s26 = int_to_ptr.vmem [resolvable:$true] %s285_s26 }
  0x11   :  { %338 = vmatprep.subr.bf16.mxu1 %v397_v1  ;;  %s373_s6 = scalar_lea.vmem %s286_s26, 128  ;;  %p378_p1 = scmp.lt.s32.totalorder %s286_s26, %s286_s26 }
  0x12   :  { %p374_p0 = scmp.ne.s32.totalorder %s286_s26, %s373_s6  ;;  %p379_p2 = scmp.lt.s32.totalorder %s373_s6, %s373_s6 }
  0x14   :  { %339 = vmatpush3.bf16.msra.mxu1 %v365_v9  ;;  %p380_p3 = por %p379_p2, %p378_p1 }
  0x15   :  { %340 = vmatprep.subr.bf16.mxu1 %v397_v1 }
  0x16   :  { %p381_p4 = pnand %p380_p3, %p374_p0 }
  0x18   :  { %341 = vmatpush3.bf16.msra.mxu1 %v366_v10 }
  0x19   :  { %342 = vmatprep.subr.bf16.mxu1 %v397_v1 }
  0x1c   :  { %343 = vmatpush3.bf16.msra.mxu1 %v367_v11 }
  0x1d   :  { %344 = vmatprep.subr.bf16.mxu1 %v397_v1 }
  0x20   :  { %345 = vmatpush3.bf16.msra.mxu1 %v368_v12 }
  0xdc   :  { %v91_v16 = vpop.f32.mrb[0].mxu0 }
  0xdd   :  { %v92_v17 = vadd.f32 %v293_v15, %v91_v16  ;;  %v328_v18 = vpop.f32.mrb[1].mxu0 }
  0xde   :  { %v94_v19 = vpop.f32.mrb[2].mxu0 }
  0xdf   :  { %v97_v20 = vmax.f32 %v92_v17, 0.0  ;;  %v329_v21 = vpop.f32.mrb[3].mxu0 }
  0xe1   :  { %v98_v22 = vpack.c.bf16 %v97_v20, %v97_v20 }
  0xe3   :  { %347 = vmatmul.mubr.bf16.vlgmr.msra.gmra.mrb[0].mxu1 %v98_v22 }
 0x1b6   :  { %v204_v24 = vpop.f32.mrb[0].mxu1 }
 0x1b7   :  { %v205_v25 = vadd.f32 %v297_v23, %v204_v24  ;;  %v348_v26 = vpop.f32.mrb[1].mxu1 }
 0x1b8   :  { %v207_v27 = vpop.f32.mrb[2].mxu1 }
 0x1b9   :  { %v210_v28 = vmax.f32 %v205_v25, 0.0  ;;  %v349_v29 = vpop.f32.mrb[3].mxu1 }
 0x1bb   :  { %v211_v30 = vpack.c.bf16 %v210_v28, %v210_v28 }
 0x1bd   :  { %353 = vmatmul.mubr.msk.bf16.vlgmr.msra.gmra.mrb[4].mxu0 %vm220_vm3, %v211_v30 }
 0x290   :  { %v262_v32 = vpop.f32.mrb[4].mxu0 }
 0x291   :  { %v263_v33 = vadd.f32 %v306_v31, %v262_v32  ;;  %v354_v34 = vpop.f32.mrb[5].mxu0 }
 0x292   :  { %v265_v35 = vpop.f32.mrb[6].mxu0 }
 0x293   :  { %v268_v36 = vsub.f32 0.0, %v263_v33  ;;  %v355_v37 = vpop.f32.mrb[7].mxu0 }
 0x295   :  { %v269_v38 = vmul.f32 1.442695, %v268_v36 }
 0x297   :  { %369 = vpow2.f32 %v269_v38 }
 0x2a1   :  { %v370_v39 = vpop.eup %369 }
 0x2a2   :  { %v271_v40 = vadd.f32 1.0, %v370_v39 }
 0x2a4   :  { %371 = vrcp.f32 %v271_v40 }
 0x2ae   :  { %v372_v43 = vpop.eup %371 }
 0x2af   :  { %v277_v44 = vsel %vm276_vm4, %v372_v43, 0.0 }
 0x2b0   :  { %278 = vst.msk [vmem:[#allocation2] sm:$0xff] %vm220_vm3, %v277_v44 }
 0x2b1   :  { %384 = shalt.err (!%p381_p4)
}
 0x2b2   :  { %s385_s29 = scalar_lea.hbm %s509_s7, 128 }
 0x2b3   :  { %p386_p5 = scmp.ne.s32.totalorder %s509_s7, %s385_s29  ;;  %p389_p6 = scmp.lt.u32.totalorder %s385_s29, %s509_s7 }
 0x2b5   :  { %p391_p7 = pnand %p389_p6, %p386_p5 }
 0x2b7   :  { %394 = shalt.err (!%p391_p7)
}
 0x2b8   :  { %288 = dma.vmem_to_hbm [thread:$0]  %s286_s26, 128, %s509_s7, [#allocation3]  }
 0x2b9   :  { %395 = dma.done.wait [#allocation3], 128  }
 0x2ba   :  { %396 = vsyncadd [#allocation3], 4294967168 }
 0x2bb   :  { %292 = vsyncpa [#allocation3], 1 }

// kernel: tpu_custom_call.1
= control target key start
LH: loop header
LB: loop body
LE: loop exit
PB: predicated region body
PF: predicated region fallthrough
CT: control target
= control target key end

     0   :  { %v397_v1 = vmov 0.0   ;;  %vm398_vm0 = vmmov 0   ;;  %vm53_vm1 = vcmask 261120   ;;  %s502_s0 = inlined_call_operand.vmem [shape: f32[8,32], index: 0, kind: input, shape index: {}]   ;;  %s503_s1 = inlined_call_operand.vmem [shape: bf16[32,128], index: 1, kind: input, shape index: {}]   ;;  %s504_s2 = inlined_call_operand.vmem [shape: f32[1,128], index: 2, kind: input, shape index: {}]   ;;  %s505_s3 = inlined_call_operand.vmem [shape: bf16[128,8], index: 3, kind: input, shape index: {}]   ;;  %s506_s4 = inlined_call_operand.vmem [shape: f32[1,8], index: 4, kind: input, shape index: {}]   ;;  %s507_s5 = inlined_call_operand.vmem [shape: bf16[8,8], index: 5, kind: input, shape index: {}]   ;;  %s508_s6 = inlined_call_operand.vmem [shape: f32[1,8], index: 6, kind: input, shape index: {}]   ;;  %s509_s7 = inlined_call_operand.hbm [shape: f32[8,8], index: 7, kind: output, shape index: {}]  }
   0x1   :  { %v359_v0 = vld [vmem:[%s503_s1] sm:$0xff]   ;;  %322 = vmatprep.subr.bf16.mxu0 %v397_v1  ;;  %v360_v2 = vld [vmem:[%s503_s1 + $0x8] sm:$0xff]   ;;  %330 = vmatprep.subr.bf16.mxu1 %v397_v1  ;;  %v363_v7 = vld [vmem:[%s505_s3 + $0x10] sm:$0xff]  }
   0x2   :  { %323 = vmatpush3.bf16.msra.mxu0 %v359_v0  ;;  %326 = vmatprep.mubr.msk.bf16.mxu0 %vm398_vm0, %v397_v1  ;;  %v28_v3 = vld [vmem:[%s502_s0] sm:$0xff]  ;;  %v362_v6 = vld [vmem:[%s505_s3 + $0x8] sm:$0xff]  }
   0x3   :  { %324 = vmatprep.subr.bf16.mxu0 %v397_v1  ;;  %v361_v4 = vld [vmem:[%s505_s3] sm:$0xff]   ;;  %346 = vmatprep.mubr.msk.bf16.mxu1 %vm398_vm0, %v397_v1  ;;  %v29_v5 = vpack.c.bf16 %v28_v3, %v28_v3 }
   0x4   :  { %331 = vmatpush3.bf16.msra.mxu1 %v361_v4 }
   0x5   :  { %332 = vmatprep.subr.bf16.mxu1 %v397_v1 }
   0x6   :  { %325 = vmatpush3.bf16.msra.mxu0 %v360_v2 }
   0x7   :  { %350 = vmatprep.subr.bf16.mxu0 %v397_v1 }
   0x8   :  { %333 = vmatpush3.bf16.msra.mxu1 %v362_v6 }
   0x9   :  { %327 = vmatmul.mubr.msk.bf16.vlgmr.msra.gmra.mrb[0].mxu0 %vm53_vm1, %v29_v5  ;;  %334 = vmatprep.subr.bf16.mxu1 %v397_v1 }
   0xa   :  { %352 = vmatprep.mubr.msk.bf16.mxu0 %vm398_vm0, %v397_v1 }
   0xb   :  { %12 = vsyncpa [#allocation3], 0  ;;  %v364_v8 = vld [vmem:[%s505_s3 + $0x18] sm:$0xff]   ;;  %v365_v9 = vld [vmem:[%s505_s3 + $0x20] sm:$0xff]   ;;  %vm224_vm2 = vcmask 1043456   ;;  %vm220_vm3 = vcmask 64512   ;;  %v274_v41 = vlaneseq }
   0xc   :  { %335 = vmatpush3.bf16.msra.mxu1 %v363_v7  ;;  %v366_v10 = vld [vmem:[%s505_s3 + $0x28] sm:$0xff]   ;;  %v367_v11 = vld [vmem:[%s505_s3 + $0x30] sm:$0xff]   ;;  %v368_v12 = vld [vmem:[%s505_s3 + $0x38] sm:$0xff]  }
   0xd   :  { %336 = vmatprep.subr.bf16.mxu1 %v397_v1  ;;  %v212_v13 = vld [vmem:[%s507_s5] sm:$0xf]  ;;  %v275_v42 = vand.u32 127, %v274_v41 }
   0xe   :  { %v226_v14 = vsel %vm224_vm2, %v212_v13, 0  ;;  %v293_v15 = vld [vmem:[%s504_s2] ss:$0 sm:$0xff] }
   0xf   :  { %351 = vmatpush3.bf16.msra.mxu0 %v226_v14  ;;  %v297_v23 = vld [vmem:[%s506_s4] ss:$0 sm:$0xff]  ;;  %s399_s4 = smov [#allocation2]   ;;  %vm276_vm4 = vcmp.lt.s32.totalorder %v275_v42, 2 }
  0x10   :  { %337 = vmatpush3.bf16.msra.mxu1 %v364_v8  ;;  %v306_v31 = vld [vmem:[%s508_s6] ss:$0 sm:$0xff]  ;;  %s285_s26 = sshll.u32 %s399_s4, 4  ;;  %s286_s26 = int_to_ptr.vmem [resolvable:$true] %s285_s26 }
  0x11   :  { %338 = vmatprep.subr.bf16.mxu1 %v397_v1  ;;  %s373_s6 = scalar_lea.vmem %s286_s26, 128  ;;  %p378_p1 = scmp.lt.s32.totalorder %s286_s26, %s286_s26 }
  0x12   :  { %p374_p0 = scmp.ne.s32.totalorder %s286_s26, %s373_s6  ;;  %p379_p2 = scmp.lt.s32.totalorder %s373_s6, %s373_s6 }
  0x14   :  { %339 = vmatpush3.bf16.msra.mxu1 %v365_v9  ;;  %p380_p3 = por %p379_p2, %p378_p1 }
  0x15   :  { %340 = vmatprep.subr.bf16.mxu1 %v397_v1 }
  0x16   :  { %p381_p4 = pnand %p380_p3, %p374_p0 }
  0x18   :  { %341 = vmatpush3.bf16.msra.mxu1 %v366_v10 }
  0x19   :  { %342 = vmatprep.subr.bf16.mxu1 %v397_v1 }
  0x1c   :  { %343 = vmatpush3.bf16.msra.mxu1 %v367_v11 }
  0x1d   :  { %344 = vmatprep.subr.bf16.mxu1 %v397_v1 }
  0x20   :  { %345 = vmatpush3.bf16.msra.mxu1 %v368_v12 }
  0xdc   :  { %v91_v16 = vpop.f32.mrb[0].mxu0 }
  0xdd   :  { %v92_v17 = vadd.f32 %v293_v15, %v91_v16  ;;  %v328_v18 = vpop.f32.mrb[1].mxu0 }
  0xde   :  { %v94_v19 = vpop.f32.mrb[2].mxu0 }
  0xdf   :  { %v97_v20 = vmax.f32 %v92_v17, 0.0  ;;  %v329_v21 = vpop.f32.mrb[3].mxu0 }
  0xe1   :  { %v98_v22 = vpack.c.bf16 %v97_v20, %v97_v20 }
  0xe3   :  { %347 = vmatmul.mubr.bf16.vlgmr.msra.gmra.mrb[0].mxu1 %v98_v22 }
 0x1b6   :  { %v204_v24 = vpop.f32.mrb[0].mxu1 }
 0x1b7   :  { %v205_v25 = vadd.f32 %v297_v23, %v204_v24  ;;  %v348_v26 = vpop.f32.mrb[1].mxu1 }
 0x1b8   :  { %v207_v27 = vpop.f32.mrb[2].mxu1 }
 0x1b9   :  { %v210_v28 = vmax.f32 %v205_v25, 0.0  ;;  %v349_v29 = vpop.f32.mrb[3].mxu1 }
 0x1bb   :  { %v211_v30 = vpack.c.bf16 %v210_v28, %v210_v28 }
 0x1bd   :  { %353 = vmatmul.mubr.msk.bf16.vlgmr.msra.gmra.mrb[4].mxu0 %vm220_vm3, %v211_v30 }
 0x290   :  { %v262_v32 = vpop.f32.mrb[4].mxu0 }
 0x291   :  { %v263_v33 = vadd.f32 %v306_v31, %v262_v32  ;;  %v354_v34 = vpop.f32.mrb[5].mxu0 }
 0x292   :  { %v265_v35 = vpop.f32.mrb[6].mxu0 }
 0x293   :  { %v268_v36 = vsub.f32 0.0, %v263_v33  ;;  %v355_v37 = vpop.f32.mrb[7].mxu0 }
 0x295   :  { %v269_v38 = vmul.f32 1.442695, %v268_v36 }
 0x297   :  { %369 = vpow2.f32 %v269_v38 }
 0x2a1   :  { %v370_v39 = vpop.eup %369 }
 0x2a2   :  { %v271_v40 = vadd.f32 1.0, %v370_v39 }
 0x2a4   :  { %371 = vrcp.f32 %v271_v40 }
 0x2ae   :  { %v372_v43 = vpop.eup %371 }
 0x2af   :  { %v277_v44 = vsel %vm276_vm4, %v372_v43, 0.0 }
 0x2b0   :  { %278 = vst.msk [vmem:[#allocation2] sm:$0xff] %vm220_vm3, %v277_v44 }
 0x2b1   :  { %384 = shalt.err (!%p381_p4)
}
 0x2b2   :  { %s385_s29 = scalar_lea.hbm %s509_s7, 128 }
 0x2b3   :  { %p386_p5 = scmp.ne.s32.totalorder %s509_s7, %s385_s29  ;;  %p389_p6 = scmp.lt.u32.totalorder %s385_s29, %s509_s7 }
 0x2b5   :  { %p391_p7 = pnand %p389_p6, %p386_p5 }
 0x2b7   :  { %394 = shalt.err (!%p391_p7)
}
 0x2b8   :  { %288 = dma.vmem_to_hbm [thread:$0]  %s286_s26, 128, %s509_s7, [#allocation3]  }
 0x2b9   :  { %395 = dma.done.wait [#allocation3], 128  }
 0x2ba   :  { %396 = vsyncadd [#allocation3], 4294967168 }
 0x2bb   :  { %292 = vsyncpa [#allocation3], 1 }

</bundles_post_ra>
